<compile_context>
chip_gen: v7x
topology: tpu7x:2x2x1
jax: 0.10.0
libtpu: 0.0.40
codegen_flags: <defaults>
</compile_context>

<pallas_src>
import functools

import jax
import jax.numpy as jnp
from jax.experimental import pallas as pl
from jax.experimental.pallas import tpu as pltpu


_OUT_DTYPES = {
    "float32": (jnp.float32, 4),
    "bfloat16": (jnp.bfloat16, 2),
    "float16": (jnp.float16, 2),
}


def _round_up(n: int, m: int) -> int:
    return ((n + m - 1) // m) * m


# --------------------------------------------------------------------------
# Kernel: one batch tile, both layers fused, weights resident in VMEM.
# Hidden dim processed in slabs of `h_chunk` (static, unrolled) so the live
# intermediate is (TM, h_chunk) instead of (TM, H_pad).
# --------------------------------------------------------------------------
def _mlp_kernel(x_ref, w1_ref, b1_ref, w2_ref, b2_ref, o_ref, *, h_chunk, n_chunks):
    # x:  (TM, D_in_pad)        f32 in HBM/VMEM; cast to compute dtype here
    # w1: (D_in_pad, H_pad)     compute dtype
    # b1: (1, H_pad)            f32
    # w2: (H_pad, D_out_pad)    compute dtype
    # b2: (1, D_out_pad)        f32
    # o:  (TM, D_out_pad)       out dtype
    x = x_ref[...].astype(w1_ref.dtype)  # in-kernel cast: free vcvt under MXU
    acc = jnp.zeros((x_ref.shape[0], o_ref.shape[1]), jnp.float32)
    for c in range(n_chunks):            # static unroll over hidden slabs
        lo = c * h_chunk
        hi = lo + h_chunk
        # Layer 1 slab: MXU matmul, f32 accumulation.
        h = jnp.dot(x, w1_ref[:, lo:hi], preferred_element_type=jnp.float32)
        # Bias + ReLU on the VPU, kept in f32 (v5e has no bf16 VALU).
        h = jnp.maximum(h + b1_ref[:, lo:hi], 0.0)
        # Layer 2 slab: feed in the weight dtype (bf16 rounds the activation;
        # with f32 weights the cast is a no-op), accumulate in f32.
        acc = acc + jnp.dot(h.astype(w2_ref.dtype), w2_ref[lo:hi, :],
                            preferred_element_type=jnp.float32)
    o_ref[...] = (acc + b2_ref[...]).astype(o_ref.dtype)


# --------------------------------------------------------------------------
# One-time parameter preparation (transpose + pad + dtype), NOT per call.
# Returned dict contains ONLY arrays (safe to pass through jax.jit).
# --------------------------------------------------------------------------
def prepare_params(params, compute_dtype=jnp.bfloat16):
    """Transpose nn.Linear-layout weights to (in, out), zero-pad feature dims
    (H, D_out -> multiples of 128; D_in -> multiple of 16) and cast the matmul
    operands to `compute_dtype` (biases stay f32)."""
    w1 = jnp.asarray(params["w1"], jnp.float32)   # (H, D_in)
    b1 = jnp.asarray(params["b1"], jnp.float32)   # (H,)
    w2 = jnp.asarray(params["w2"], jnp.float32)   # (D_out, H)
    b2 = jnp.asarray(params["b2"], jnp.float32)   # (D_out,)

    H, D_in = w1.shape
    D_out = w2.shape[0]
    H_pad = _round_up(H, 128)
    D_out_pad = _round_up(D_out, 128)
    D_in_pad = _round_up(D_in, 16)   # dense sublane packing for bf16 w1 rows

    w1_t = jnp.pad(w1, ((0, H_pad - H), (0, D_in_pad - D_in))).T.astype(compute_dtype)
    b1_p = jnp.pad(b1, (0, H_pad - H)).reshape(1, H_pad)
    w2_t = jnp.pad(w2, ((0, D_out_pad - D_out), (0, H_pad - H))).T.astype(compute_dtype)
    b2_p = jnp.pad(b2, (0, D_out_pad - D_out)).reshape(1, D_out_pad)

    return {"w1_t": w1_t, "b1": b1_p, "w2_t": w2_t, "b2": b2_p}


# --------------------------------------------------------------------------
# Sizing helpers (all pure-Python, trace-time).
# --------------------------------------------------------------------------
def _vmem_cap_bytes() -> int:
    try:
        phys = int(pltpu.get_tpu_info().vmem_capacity_bytes)
    except Exception:
        phys = 64 << 20  # conservative fallback (v7x-sized VMEM)
    return int(phys * 0.85)  # headroom for compiler-internal scratch


def _vmem_footprint_bytes(tm, d_in_pad, h_pad, d_out_pad, h_chunk, csize, osize) -> int:
    io = 2 * tm * (d_in_pad * 4 + d_out_pad * osize)          # double-buffered x / out tiles
    weights = ((d_in_pad * h_pad + h_pad * d_out_pad) * csize  # single-buffered weights
               + (h_pad + d_out_pad) * 4)                      # + f32 biases
    live = tm * h_chunk * (4 + csize) + tm * d_out_pad * 4     # h (f32 + cast) + f32 acc
    return io + weights + live


def _plan_batch_tiling(B, sublane, fits):
    """Pick (B_pad, TM): >=2 tiles once B_pad >= 128 (v7x megacore), minimal
    padding waste, largest tile whose VMEM footprint fits."""
    b_small = _round_up(B, sublane)
    if b_small < 128:
        return b_small, b_small                       # tiny batch: one tile
    cands = [(_round_up(B, tm), tm) for tm in (512, 256, 128, 64)]
    # prefer >=2 tiles, then minimal padding waste, then larger tile
    cands.sort(key=lambda c: (-(1 if c[0] // c[1] >= 2 else 0), c[0] - B, -c[1]))
    for bp, tm in cands:
        if fits(tm):
            return bp, tm
    return min(cands, key=lambda c: c[1])             # smallest tile as last resort


def _invariant_spec(block_shape):
    """Grid-invariant operand: request single buffering (double-buffering a
    constant-index block only wastes VMEM). Falls back if unsupported."""
    idx = lambda i: (0, 0)
    try:
        return pl.BlockSpec(block_shape, idx, pipeline_mode=pl.Buffered(1))
    except Exception:
        return pl.BlockSpec(block_shape, idx)


# --------------------------------------------------------------------------
# Forward pass: grid over batch tiles, weights broadcast (resident) per tile.
# --------------------------------------------------------------------------
@functools.partial(jax.jit, static_argnames=("batch_size", "output_size", "out_dtype"))
def model_forward(prepared, inp, batch_size, output_size, out_dtype="float32"):
    """Mirrors Model.forward: flatten to (batch_size, -1), then fused MLP."""
    x = jnp.asarray(inp, jnp.float32).reshape(batch_size, -1)

    w1_t, b1 = prepared["w1_t"], prepared["b1"]
    w2_t, b2 = prepared["w2_t"], prepared["b2"]
    D_in_pad, H_pad = w1_t.shape
    D_out_pad = w2_t.shape[1]
    compute_dtype = w1_t.dtype
    csize = compute_dtype.itemsize
    out_dt, osize = _OUT_DTYPES[out_dtype]

    B, D_in = x.shape
    if D_in > D_in_pad:
        raise ValueError(f"input features {D_in} exceed prepared weights {D_in_pad}")

    # Hidden-dim chunking (review: shrink the live intermediate, interleave MXU passes).
    if H_pad <= 512:
        h_chunk = H_pad
    else:
        h_chunk = max(c for c in (512, 384, 256, 128) if H_pad % c == 0)
    n_chunks = H_pad // h_chunk

    # Batch tiling: sublane-aligned, megacore-friendly, VMEM-feasible.
    sublane = 32 // csize                      # 8 for f32, 16 for bf16
    cap = _vmem_cap_bytes()
    fits = lambda tm: (_vmem_footprint_bytes(tm, D_in_pad, H_pad, D_out_pad,
                                             h_chunk, csize, osize)
                       + (2 << 20)) <= cap
    B_pad, TM = _plan_batch_tiling(B, sublane, fits)

    # x stays f32 in HBM; cast to compute dtype happens inside the kernel.
    x_p = jnp.pad(x, ((0, B_pad - B), (0, D_in_pad - D_in)))

    grid = (B_pad // TM,)

    need = _vmem_footprint_bytes(TM, D_in_pad, H_pad, D_out_pad, h_chunk, csize, osize)
    vmem_limit = int(min(max(need + (4 << 20), 32 << 20), cap))

    cost = pl.CostEstimate(
        flops=2 * B_pad * (D_in_pad * H_pad + H_pad * D_out_pad),
        transcendentals=0,
        bytes_accessed=(x_p.size * 4 + w1_t.size * csize + w2_t.size * csize
                        + b1.size * 4 + b2.size * 4 + B_pad * D_out_pad * osize),
    )

    kernel = functools.partial(_mlp_kernel, h_chunk=h_chunk, n_chunks=n_chunks)

    out_padded = pl.pallas_call(
        kernel,
        out_shape=jax.ShapeDtypeStruct((B_pad, D_out_pad), out_dt),
        grid=grid,
        in_specs=[
            pl.BlockSpec((TM, D_in_pad), lambda i: (i, 0)),    # x batch tile (pipelined)
            _invariant_spec((D_in_pad, H_pad)),                # w1 (resident, single-buffered)
            _invariant_spec((1, H_pad)),                       # b1
            _invariant_spec((H_pad, D_out_pad)),               # w2 (resident, single-buffered)
            _invariant_spec((1, D_out_pad)),                   # b2
        ],
        out_specs=pl.BlockSpec((TM, D_out_pad), lambda i: (i, 0)),
        compiler_params=pltpu.CompilerParams(
            dimension_semantics=("parallel",),   # batch tiles -> 2 TCs on v7x
            vmem_limit_bytes=vmem_limit,
        ),
        cost_estimate=cost,
    )(x_p, w1_t, b1, w2_t, b2)

    # Strip padding back to the logical shape.
    return out_padded[:batch_size, :output_size]


# --------------------------------------------------------------------------
# Init matching nn.Linear (weights in (out_features, in_features) layout).
# --------------------------------------------------------------------------
def init_params(key, input_size, hidden_size, output_size):
    k1, k2, k3, k4 = jax.random.split(key, 4)
    bound1 = 1.0 / jnp.sqrt(input_size)
    bound2 = 1.0 / jnp.sqrt(hidden_size)
    return {
        "w1": jax.random.uniform(k1, (hidden_size, input_size), jnp.float32,
                                 -bound1, bound1),
        "b1": jax.random.uniform(k2, (hidden_size,), jnp.float32, -bound1, bound1),
        "w2": jax.random.uniform(k3, (output_size, hidden_size), jnp.float32,
                                 -bound2, bound2),
        "b2": jax.random.uniform(k4, (output_size,), jnp.float32, -bound2, bound2),
    }


def _reference(params, x_flat):
    return jnp.maximum(x_flat @ params["w1"].T + params["b1"], 0.0) \
        @ params["w2"].T + params["b2"]


if __name__ == "__main__":
    key = jax.random.PRNGKey(0)
    batch_size, input_size, hidden_size, output_size = 2, 32, 64, 16

    kp, kx, kx2 = jax.random.split(key, 3)
    params = init_params(kp, input_size, hidden_size, output_size)
    # Input arrives un-flattened (e.g. (batch, 4, 8)); forward flattens it.
    x = jax.random.normal(kx, (batch_size, 4, 8), jnp.float32)
    ref = _reference(params, x.reshape(batch_size, -1))

    # f32 MXU path: tight check.
    prep_f32 = prepare_params(params, compute_dtype=jnp.float32)
    out = jax.block_until_ready(
        model_forward(prep_f32, x, batch_size, output_size))
    assert out.shape == (batch_size, output_size)
    assert jnp.allclose(out, ref, atol=1e-5, rtol=1e-5)

    # bf16 MXU path (default / recommended): f32 accumulation, loose check.
    prep_bf16 = prepare_params(params)  # default compute dtype = bf16
    out_bf16 = jax.block_until_ready(
        model_forward(prep_bf16, x, batch_size, output_size))
    assert out_bf16.shape == (batch_size, output_size)
    assert jnp.allclose(out_bf16, ref, atol=1e-1, rtol=1e-1)

    # Larger batch: exercises the multi-tile grid / megacore path.
    big_batch = 160
    xb = jax.random.normal(kx2, (big_batch, input_size), jnp.float32)
    refb = _reference(params, xb)
    outb = jax.block_until_ready(
        model_forward(prep_f32, xb, big_batch, output_size))
    assert outb.shape == (big_batch, output_size)
    assert jnp.allclose(outb, refb, atol=1e-4, rtol=1e-4)

    print("KERNEL_OK")
</pallas_src>

<mosaic_0001>
module attributes {stable_mosaic.version = 11 : i64} {
  func.func @_mlp_kernel(%arg0: i32, %arg1: memref<8x32xf32, #tpu.memory_space<vmem>>, %arg2: memref<32x128xf32, #tpu.memory_space<vmem>>, %arg3: memref<1x128xf32, #tpu.memory_space<vmem>>, %arg4: memref<128x128xf32, #tpu.memory_space<vmem>>, %arg5: memref<1x128xf32, #tpu.memory_space<vmem>>, %arg6: memref<8x128xf32, #tpu.memory_space<vmem>>) attributes {dimension_semantics = [#tpu.dimension_semantics<parallel>], iteration_bounds = array<i64: 1>, scalar_prefetch = 0 : i64, scratch_operands = 0 : i64, tpu.core_type = #tpu.core_type<tc>, window_params = [{transform_indices = @transform_0, window_bounds = array<i64: 8, 32>}, {pipeline_mode = #tpu.pipeline_mode<synchronous>, transform_indices = @transform_1, window_bounds = array<i64: 32, 128>}, {pipeline_mode = #tpu.pipeline_mode<synchronous>, transform_indices = @transform_2, window_bounds = array<i64: 1, 128>}, {pipeline_mode = #tpu.pipeline_mode<synchronous>, transform_indices = @transform_3, window_bounds = array<i64: 128, 128>}, {pipeline_mode = #tpu.pipeline_mode<synchronous>, transform_indices = @transform_4, window_bounds = array<i64: 1, 128>}, {transform_indices = @transform_5, window_bounds = array<i64: 8, 128>}]} {
    %c0 = arith.constant 0 : index
    %c0_0 = arith.constant 0 : index
    %0 = vector.load %arg1[%c0, %c0_0] : memref<8x32xf32, #tpu.memory_space<vmem>>, vector<8x32xf32>
    %cst = arith.constant 0.000000e+00 : f32
    %1 = vector.broadcast %cst : f32 to vector<8x128xf32>
    %c0_1 = arith.constant 0 : index
    %c0_2 = arith.constant 0 : index
    %2 = vector.load %arg2[%c0_1, %c0_2] : memref<32x128xf32, #tpu.memory_space<vmem>>, vector<32x128xf32>
    %cst_3 = arith.constant dense<0.000000e+00> : vector<8x128xf32>
    %3 = tpu.matmul %0, %2, %cst_3 {dimension_numbers = #tpu.dot_dimension_numbers<[1], [0], [0], [1], [0, 0, 1, 1], [], []>} : vector<8x32xf32>, vector<32x128xf32>, vector<8x128xf32> -> vector<8x128xf32>
    %c0_4 = arith.constant 0 : index
    %c0_5 = arith.constant 0 : index
    %4 = vector.load %arg3[%c0_4, %c0_5] : memref<1x128xf32, #tpu.memory_space<vmem>>, vector<1x128xf32>
    %5 = vector.broadcast %4 : vector<1x128xf32> to vector<8x128xf32>
    %6 = arith.addf %3, %5 : vector<8x128xf32>
    %cst_6 = arith.constant 0.000000e+00 : f32
    %7 = vector.broadcast %cst_6 : f32 to vector<8x128xf32>
    %8 = arith.maximumf %6, %7 : vector<8x128xf32>
    %c0_7 = arith.constant 0 : index
    %c0_8 = arith.constant 0 : index
    %9 = vector.load %arg4[%c0_7, %c0_8] : memref<128x128xf32, #tpu.memory_space<vmem>>, vector<128x128xf32>
    %cst_9 = arith.constant dense<0.000000e+00> : vector<8x128xf32>
    %10 = tpu.matmul %8, %9, %cst_9 {dimension_numbers = #tpu.dot_dimension_numbers<[1], [0], [0], [1], [0, 0, 1, 1], [], []>} : vector<8x128xf32>, vector<128x128xf32>, vector<8x128xf32> -> vector<8x128xf32>
    %11 = arith.addf %1, %10 : vector<8x128xf32>
    %c0_10 = arith.constant 0 : index
    %c0_11 = arith.constant 0 : index
    %12 = vector.load %arg5[%c0_10, %c0_11] : memref<1x128xf32, #tpu.memory_space<vmem>>, vector<1x128xf32>
    %13 = vector.broadcast %12 : vector<1x128xf32> to vector<8x128xf32>
    %14 = arith.addf %11, %13 : vector<8x128xf32>
    %c0_12 = arith.constant 0 : index
    %c0_13 = arith.constant 0 : index
    %15 = vector.load %arg6[%c0_12, %c0_13] : memref<8x128xf32, #tpu.memory_space<vmem>>, vector<8x128xf32>
    tpu.vector_store %arg6[%c0_12, %c0_13], %14 {strides = array<i32>} : memref<8x128xf32, #tpu.memory_space<vmem>>, vector<8x128xf32>,
    return
  }
  func.func @transform_0(%arg0: i32) -> (i32, i32) {
    %c0_i32 = arith.constant 0 : i32
    %c0_i32_0 = arith.constant 0 : i32
    return %arg0, %c0_i32 : i32, i32
  }
  func.func @transform_1(%arg0: i32) -> (i32, i32) {
    %c0_i32 = arith.constant 0 : i32
    %c0_i32_0 = arith.constant 0 : i32
    %c0_i32_1 = arith.constant 0 : i32
    return %c0_i32, %c0_i32_0 : i32, i32
  }
  func.func @transform_2(%arg0: i32) -> (i32, i32) {
    %c0_i32 = arith.constant 0 : i32
    %c0_i32_0 = arith.constant 0 : i32
    %c0_i32_1 = arith.constant 0 : i32
    return %c0_i32, %c0_i32_0 : i32, i32
  }
  func.func @transform_3(%arg0: i32) -> (i32, i32) {
    %c0_i32 = arith.constant 0 : i32
    %c0_i32_0 = arith.constant 0 : i32
    %c0_i32_1 = arith.constant 0 : i32
    return %c0_i32, %c0_i32_0 : i32, i32
  }
  func.func @transform_4(%arg0: i32) -> (i32, i32) {
    %c0_i32 = arith.constant 0 : i32
    %c0_i32_0 = arith.constant 0 : i32
    %c0_i32_1 = arith.constant 0 : i32
    return %c0_i32, %c0_i32_0 : i32, i32
  }
  func.func @transform_5(%arg0: i32) -> (i32, i32) {
    %c0_i32 = arith.constant 0 : i32
    %c0_i32_0 = arith.constant 0 : i32
    return %arg0, %c0_i32 : i32, i32
  }
}

</mosaic_0001>

<bundles_post_ra>
// kernel: model_forward.1
= control target key start
LH: loop header
LB: loop body
LE: loop exit
PB: predicated region body
PF: predicated region fallthrough
CT: control target
= control target key end

     0   :  { %10 = vsyncpa [#allocation3], 0  ;;  %s464_s0 = inlined_call_operand.vmem [shape: f32[8,32], index: 0, kind: input, shape index: {}]   ;;  %s465_s1 = inlined_call_operand.hbm [shape: f32[32,128], index: 1, kind: input, shape index: {}]   ;;  %s466_s2 = inlined_call_operand.vmem [shape: f32[1,128], index: 2, kind: input, shape index: {}]   ;;  %s467_s3 = inlined_call_operand.hbm [shape: f32[128,128], index: 3, kind: input, shape index: {}]   ;;  %s468_s4 = inlined_call_operand.vmem [shape: f32[1,128], index: 4, kind: input, shape index: {}]   ;;  %s469_s5 = inlined_call_operand.vmem [shape: f32[8,128], index: 5, kind: output, shape index: {}]  }
   0x1   :  { %11 = vsyncpa [#allocation5], 0  ;;  %s391_s18 = smov [#allocation2]   ;;  %s343_s22 = scalar_lea.hbm %s465_s1, 512 }
   0x2   :  { %s19_s19 = sshll.u32 %s391_s18, 4  ;;  %p344_p0 = scmp.ne.s32.totalorder %s465_s1, %s343_s22  ;;  %s20_s19 = int_to_ptr.vmem [resolvable:$true] %s19_s19 }
   0x3   :  { %p347_p1 = scmp.lt.u32.totalorder %s343_s22, %s465_s1 }
   0x5   :  { %p349_p2 = pnand %p347_p1, %p344_p0 }
   0x7   :  { %352 = shalt.err (!%p349_p2)
}
   0x8   :  { %s353_s27 = scalar_lea.vmem %s20_s19, 512  ;;  %p358_p4 = scmp.lt.s32.totalorder %s20_s19, %s20_s19 }
   0x9   :  { %p354_p3 = scmp.ne.s32.totalorder %s20_s19, %s353_s27  ;;  %p359_p5 = scmp.lt.s32.totalorder %s353_s27, %s353_s27 }
   0xb   :  { %p360_p6 = por %p359_p5, %p358_p4 }
   0xd   :  { %p361_p7 = pnand %p360_p6, %p354_p3 }
   0xf   :  { %364 = shalt.err (!%p361_p7)
}
  0x10   :  { %s392_s28 = smov 128   ;;  %s393_s29 = smov 8  }
  0x11   :  { %25 = dma.hbm_to_vmem [thread:$0]  %s465_s1, 512, %s20_s19, [#allocation3], %s392_s28, %s392_s28, %s393_s29  }
  0x12   :  { %s394_s7 = smov [#allocation4]   ;;  %s365_s11 = scalar_lea.hbm %s467_s3, 2048 }
  0x13   :  { %s33_s8 = sshll.u32 %s394_s7, 4  ;;  %p366_p8 = scmp.ne.s32.totalorder %s467_s3, %s365_s11  ;;  %s34_s8 = int_to_ptr.vmem [resolvable:$true] %s33_s8 }
  0x14   :  { %p369_p9 = scmp.lt.u32.totalorder %s365_s11, %s467_s3 }
  0x16   :  { %p371_p10 = pnand %p369_p9, %p366_p8 }
  0x18   :  { %374 = shalt.err (!%p371_p10)
}
  0x19   :  { %s375_s16 = scalar_lea.vmem %s34_s8, 2048  ;;  %p380_p12 = scmp.lt.s32.totalorder %s34_s8, %s34_s8 }
  0x1a   :  { %p376_p11 = scmp.ne.s32.totalorder %s34_s8, %s375_s16  ;;  %p381_p13 = scmp.lt.s32.totalorder %s375_s16, %s375_s16 }
  0x1c   :  { %p382_p0 = por %p381_p13, %p380_p12 }
  0x1e   :  { %p383_p1 = pnand %p382_p0, %p376_p11 }
  0x20   :  { %386 = shalt.err (!%p383_p1)
}
  0x21   :  { %39 = dma.hbm_to_vmem [thread:$0]  %s467_s3, 2048, %s34_s8, [#allocation5], %s392_s28, %s392_s28, %s393_s29  }
  0x22   :  { %387 = dma.done.wait [#allocation3], 512  }
  0x23   :  { %388 = vsyncadd [#allocation3], 4294966784 }
  0x24   :  { %389 = dma.done.wait [#allocation5], 2048  }
  0x25   :  { %390 = vsyncadd [#allocation5], 4294965248  ;;  %v395_v0 = vmov 0.0|0.0   ;;  %vm396_vm0 = vmmov 0   ;;  %v397_v1 = vmov 0.0   ;;  %v49_v2 = vld [vmem:[#allocation2] sm:$0xff] }
  0x26   :  { %306 = vmatprep.subr.bf16.mxu0 %v395_v0  ;;  %268 = vmatprep.mubr.msk.f32.mxu0 %vm396_vm0, %v397_v1  ;;  %v50_v3 = vld [vmem:[#allocation2 + $0x8] sm:$0xff]  ;;  %v51_v4 = vld [vmem:[#allocation2 + $0x10] sm:$0xff]  ;;  %v52_v6 = vld [vmem:[#allocation2 + $0x18] sm:$0xff]  ;;  %vm60_vm1 = vcmask 261120  }
  0x27   :  { %312 = vmatprep.subr.bf16.mxu1 %v395_v0  ;;  %303 = vmatprep.mubr.msk.f32.mxu1 %vm396_vm0, %v397_v1  ;;  %v307_v5 = vpack.c.bf16 %v50_v3, %v49_v2  ;;  %v135_v7 = vld [vmem:[#allocation4] sm:$0xff]  ;;  %v136_v8 = vld [vmem:[#allocation4 + $0x8] sm:$0xff]  ;;  %v137_v9 = vld [vmem:[#allocation4 + $0x10] sm:$0xff]  ;;  %v310_v11 = vpack.c.bf16 %v52_v6, %v51_v4 }
  0x28   :  { %v138_v10 = vld [vmem:[#allocation4 + $0x18] sm:$0xff]  ;;  %v313_v12 = vpack.c.bf16 %v136_v8, %v135_v7  ;;  %v139_v14 = vld [vmem:[#allocation4 + $0x20] sm:$0xff]  ;;  %v140_v15 = vld [vmem:[#allocation4 + $0x28] sm:$0xff] }
  0x29   :  { %308 = vmatpush3.bf16.msra.mxu0 %v307_v5  ;;  %v316_v13 = vpack.c.bf16 %v138_v10, %v137_v9  ;;  %v48_v16 = vld [vmem:[%s464_s0] sm:$0xff]  ;;  %v319_v17 = vpack.c.bf16 %v140_v15, %v139_v14  ;;  %v141_v18 = vld [vmem:[#allocation4 + $0x30] sm:$0xff]  ;;  %v142_v19 = vld [vmem:[#allocation4 + $0x38] sm:$0xff] }
  0x2a   :  { %309 = vmatprep.subr.bf16.mxu0 %v395_v0  ;;  %314 = vmatpush3.bf16.msra.mxu1 %v313_v12  ;;  %v322_v20 = vpack.c.bf16 %v142_v19, %v141_v18  ;;  %v143_v21 = vld [vmem:[#allocation4 + $0x40] sm:$0xff]  ;;  %v144_v22 = vld [vmem:[#allocation4 + $0x48] sm:$0xff]  ;;  %v145_v24 = vld [vmem:[#allocation4 + $0x50] sm:$0xff] }
  0x2b   :  { %315 = vmatprep.subr.bf16.mxu1 %v395_v0  ;;  %v325_v23 = vpack.c.bf16 %v144_v22, %v143_v21  ;;  %v146_v25 = vld [vmem:[#allocation4 + $0x58] sm:$0xff]  ;;  %v147_v27 = vld [vmem:[#allocation4 + $0x60] sm:$0xff]  ;;  %v148_v28 = vld [vmem:[#allocation4 + $0x68] sm:$0xff] }
  0x2c   :  { %v328_v26 = vpack.c.bf16 %v146_v25, %v145_v24  ;;  %v331_v29 = vpack.c.bf16 %v148_v28, %v147_v27  ;;  %v149_v30 = vld [vmem:[#allocation4 + $0x70] sm:$0xff]  ;;  %v150_v31 = vld [vmem:[#allocation4 + $0x78] sm:$0xff]  ;;  %v235_v33 = vld [vmem:[%s466_s2] ss:$0 sm:$0xff] }
  0x2d   :  { %311 = vmatpush3.bf16.msra.mxu0 %v310_v11  ;;  %v334_v32 = vpack.c.bf16 %v150_v31, %v149_v30  ;;  %v237_v38 = vld [vmem:[%s468_s4] ss:$0 sm:$0xff] }
  0x2e   :  { %317 = vmatpush3.bf16.msra.mxu1 %v316_v13 }
  0x2f   :  { %318 = vmatprep.subr.bf16.mxu1 %v395_v0 }
  0x30   :  { %269 = vmatmul.mubr.msk.f32.vlgmr.msra.gmra.mrb[0].mxu0 %vm60_vm1, %v48_v16 }
  0x32   :  { %320 = vmatpush3.bf16.msra.mxu1 %v319_v17 }
  0x33   :  { %321 = vmatprep.subr.bf16.mxu1 %v395_v0 }
  0x36   :  { %323 = vmatpush3.bf16.msra.mxu1 %v322_v20 }
  0x37   :  { %324 = vmatprep.subr.bf16.mxu1 %v395_v0 }
  0x3a   :  { %326 = vmatpush3.bf16.msra.mxu1 %v325_v23 }
  0x3b   :  { %327 = vmatprep.subr.bf16.mxu1 %v395_v0 }
  0x3e   :  { %329 = vmatpush3.bf16.msra.mxu1 %v328_v26 }
  0x3f   :  { %330 = vmatprep.subr.bf16.mxu1 %v395_v0 }
  0x42   :  { %332 = vmatpush3.bf16.msra.mxu1 %v331_v29 }
  0x43   :  { %333 = vmatprep.subr.bf16.mxu1 %v395_v0 }
  0x46   :  { %335 = vmatpush3.bf16.msra.mxu1 %v334_v32 }
 0x103   :  { %v130_v34 = vpop.f32.mrb[0].mxu0 }
 0x104   :  { %v131_v35 = vadd.f32 %v235_v33, %v130_v34  ;;  %v270_v36 = vpop.f32.mrb[1].mxu0 }
 0x106   :  { %v134_v37 = vmax.f32 %v131_v35, 0.0 }
 0x108   :  { %304 = vmatmul.mubr.f32.vlgmr.msra.gmra.mrb[0].mxu1 %v134_v37 }
 0x1db   :  { %v224_v39 = vpop.f32.mrb[0].mxu1 }
 0x1dc   :  { %v225_v40 = vadd.f32 %v237_v38, %v224_v39  ;;  %v305_v41 = vpop.f32.mrb[1].mxu1 }
 0x1de   :  { %228 = vst [vmem:[%s469_s5] sm:$0xff] %v225_v40 }
 0x1df   :  { %233 = vsyncpa [#allocation3], 1 }
 0x1e0   :  { %234 = vsyncpa [#allocation5], 1 }

</bundles_post_ra>
